<compile_context>
chip_gen: v7x
topology: tpu7x:2x2x1
jax: 0.10.0
libtpu: 0.0.40
codegen_flags: <defaults>
</compile_context>

<pallas_src>
import jax
import jax.numpy as jnp
from jax.experimental import pallas as pl
from jax.experimental.pallas import tpu as pltpu


# ----------------------------------------------------------------------------
# Kernel: mean over the segment axis for a batched, flattened block.
#   x_ref: (nb, T*D) VMEM block (lane/sublane dense)
#   o_ref: (nb, D)   VMEM block
# ----------------------------------------------------------------------------
def _avg_consensus_kernel(x_ref, o_ref):
    d = o_ref.shape[-1]
    t_seg = x_ref.shape[-1] // d
    # Static, lane-aligned slices; f32 accumulation (needed for bf16 inputs).
    acc = x_ref[:, 0:d].astype(jnp.float32)
    for t in range(1, t_seg):
        acc = acc + x_ref[:, t * d:(t + 1) * d].astype(jnp.float32)
    o_ref[...] = (acc * jnp.float32(1.0 / t_seg)).astype(o_ref.dtype)


# ----------------------------------------------------------------------------
# Generation-aware tiling config (best effort; conservative fallback).
# ----------------------------------------------------------------------------
def _tpu_generation_config():
    target = 4 * 1024 * 1024        # per input block (double-buffered by Pallas)
    vmem_limit = 32 * 1024 * 1024   # explicit limit (v5e scoped default is 16 MiB)
    num_tc = 1
    try:
        kind = jax.devices()[0].device_kind.lower()
    except Exception:
        return target, vmem_limit, num_tc
    if "v7" in kind:
        # 64 MiB VMEM per TC, 2 TCs per chip, ~1.6 TB/s per TC.
        target, vmem_limit, num_tc = 10 * 1024 * 1024, 48 * 1024 * 1024, 2
    elif "v6" in kind:
        # 128 MiB VMEM, single TC, ~1.4 TB/s.
        target, vmem_limit, num_tc = 14 * 1024 * 1024, 64 * 1024 * 1024, 1
    elif "v5p" in kind or "v4" in kind:
        # Megacore parts: 2 TCs behind one device.
        target, vmem_limit, num_tc = 8 * 1024 * 1024, 48 * 1024 * 1024, 2
    # v5e / unknown: keep conservative defaults.
    return target, vmem_limit, num_tc


def _should_use_pallas(N, T, D, itemsize, vmem_limit, force):
    if D % 128 != 0 or N < 8:
        return False
    # Flattened (nb, T*D) block is dense, so this accounting is exact.
    row_bytes = T * D * itemsize
    # Smallest block (nb = 8), double-buffered input + output + f32 accumulator.
    min_block = 8 * (2 * row_bytes + 2 * D * itemsize + 4 * D)
    if min_block > vmem_limit - (2 << 20):
        # TODO(synk): add a second grid axis tiling D (block (nb, T, dtile)) for
        # extremely wide per-segment rows instead of falling back to XLA.
        return False
    if force:
        return True
    # Only worth a kernel launch once there is real HBM traffic to stream.
    return N * row_bytes >= 2 * 1024 * 1024


def _pick_nb(N, T, D, itemsize, target_block_bytes, vmem_limit, num_tc):
    row_bytes = T * D * itemsize
    nb = target_block_bytes // max(row_bytes, 1)
    nb = max(8, (nb // 8) * 8)

    # Safety cap: double-buffered in + out + f32 accumulator within the limit.
    per_row = 2 * row_bytes + 2 * D * itemsize + 4 * D
    max_nb = ((vmem_limit - (4 << 20)) // max(per_row, 1) // 8) * 8
    if max_nb >= 8:
        nb = min(nb, max_nb)

    # On 2-TC parts keep >= 2 grid steps per TensorCore when N permits
    # (pipelining within each core + balanced split). Single-TC parts keep the
    # biggest block — the grid is just a serial loop there.
    if num_tc > 1:
        cap = (N // (2 * num_tc) // 8) * 8
        if cap >= 8:
            nb = min(nb, cap)

    nb = min(nb, N)
    if nb < N:
        nb = max(8, (nb // 8) * 8)
    return nb


def _avg_consensus_pallas(x, nb, vmem_limit):
    N, T, D = x.shape
    x2 = x.reshape(N, T * D)  # free metadata reshape; makes the block (8,128)-dense
    out2d = pl.pallas_call(
        _avg_consensus_kernel,
        out_shape=jax.ShapeDtypeStruct((N, D), x.dtype),
        grid_spec=pltpu.PrefetchScalarGridSpec(
            num_scalar_prefetch=0,
            grid=(pl.cdiv(N, nb),),
            in_specs=[pl.BlockSpec((nb, T * D), lambda i: (i, 0))],
            out_specs=pl.BlockSpec((nb, D), lambda i: (i, 0)),
        ),
        compiler_params=pltpu.CompilerParams(
            dimension_semantics=("parallel",),
            vmem_limit_bytes=vmem_limit,
        ),
    )(x2)
    return out2d.reshape(N, 1, D)


# ----------------------------------------------------------------------------
# Public wrapper: JAX/Pallas equivalent of ConsensusModule.forward
# ----------------------------------------------------------------------------
def consensus_module(x, consensus_type="avg", dim=1, force_pallas=False,
                     block_rows=None):
    if consensus_type == "rnn":
        consensus_type = "identity"

    if consensus_type == "identity":
        # Pure identity: no kernel, no copy, no extra HBM traffic.
        return x

    if consensus_type != "avg":
        # Matches the PyTorch module: unknown consensus types produce None.
        return None

    if x.ndim != 3 or dim != 1:
        # General-rank / other-dim case: let XLA handle it.
        return jnp.mean(x, axis=dim, keepdims=True)

    N, T, D = x.shape
    itemsize = jnp.dtype(x.dtype).itemsize
    target_block, vmem_limit, num_tc = _tpu_generation_config()

    if _should_use_pallas(N, T, D, itemsize, vmem_limit, force_pallas):
        nb = block_rows if block_rows is not None else _pick_nb(
            N, T, D, itemsize, target_block, vmem_limit, num_tc)
        return _avg_consensus_pallas(x, nb, vmem_limit)

    # Tiny or lane-unaligned shapes: XLA's fused reduction is strictly faster.
    return jnp.mean(x, axis=1, keepdims=True)


# ----------------------------------------------------------------------------
# Self-test
# ----------------------------------------------------------------------------
if __name__ == "__main__":
    key = jax.random.PRNGKey(0)

    # 1) Small, lane-unaligned shape (typical TSN config) -> XLA fallback path.
    N0, T0, D0 = 2, 8, 32
    x_small = jax.random.normal(key, (N0, T0, D0), dtype=jnp.float32)

    out_small = jax.block_until_ready(consensus_module(x_small, "avg", dim=1))
    ref_small = jnp.mean(x_small, axis=1, keepdims=True)
    assert out_small.shape == (N0, 1, D0)
    assert jnp.allclose(out_small, ref_small, atol=1e-5, rtol=1e-5)

    out_id = jax.block_until_ready(consensus_module(x_small, "identity", dim=1))
    assert out_id.shape == x_small.shape
    assert jnp.allclose(out_id, x_small)

    out_rnn = jax.block_until_ready(consensus_module(x_small, "rnn", dim=1))
    assert jnp.allclose(out_rnn, x_small)

    # 2) Lane-aligned shape -> exercises the Pallas kernel (flattened blocks).
    N1, T1, D1 = 64, 8, 256
    key, sub = jax.random.split(key)
    x_big = jax.random.normal(sub, (N1, T1, D1), dtype=jnp.float32)

    out_big = jax.block_until_ready(
        consensus_module(x_big, "avg", dim=1, force_pallas=True))
    ref_big = jnp.mean(x_big, axis=1, keepdims=True)
    assert out_big.shape == (N1, 1, D1)
    assert jnp.allclose(out_big, ref_big, atol=1e-5, rtol=1e-5)

    # bf16 input: f32 accumulation inside the kernel, cast back on store.
    x_bf16 = x_big.astype(jnp.bfloat16)
    out_bf16 = jax.block_until_ready(
        consensus_module(x_bf16, "avg", dim=1, force_pallas=True))
    ref_bf16 = jnp.mean(x_bf16.astype(jnp.float32), axis=1, keepdims=True)
    assert out_bf16.shape == (N1, 1, D1)
    assert jnp.allclose(out_bf16.astype(jnp.float32), ref_bf16, atol=1e-2, rtol=1e-2)

    # 3) Ragged N (block does not divide N) -> partial final output block.
    N2, T2, D2 = 72, 4, 256
    key, sub = jax.random.split(key)
    x_rag = jax.random.normal(sub, (N2, T2, D2), dtype=jnp.float32)
    out_rag = jax.block_until_ready(
        consensus_module(x_rag, "avg", dim=1, force_pallas=True, block_rows=16))
    ref_rag = jnp.mean(x_rag, axis=1, keepdims=True)
    assert out_rag.shape == (N2, 1, D2)
    assert jnp.allclose(out_rag, ref_rag, atol=1e-5, rtol=1e-5)

    # 4) Odd T (the case where the old 3-D block sublane-padded 3 -> 8 rows).
    N3, T3, D3 = 40, 3, 128
    key, sub = jax.random.split(key)
    x_t3 = jax.random.normal(sub, (N3, T3, D3), dtype=jnp.float32)
    out_t3 = jax.block_until_ready(
        consensus_module(x_t3, "avg", dim=1, force_pallas=True))
    ref_t3 = jnp.mean(x_t3, axis=1, keepdims=True)
    assert out_t3.shape == (N3, 1, D3)
    assert jnp.allclose(out_t3, ref_t3, atol=1e-5, rtol=1e-5)

    print("KERNEL_OK")
</pallas_src>

<mosaic_0001>
module attributes {stable_mosaic.version = 11 : i64} {
  func.func @_avg_consensus_kernel(%arg0: i32, %arg1: memref<64x2048xf32, #tpu.memory_space<vmem>>, %arg2: memref<64x256xf32, #tpu.memory_space<vmem>>) attributes {dimension_semantics = [#tpu.dimension_semantics<parallel>], iteration_bounds = array<i64: 1>, scalar_prefetch = 0 : i64, scratch_operands = 0 : i64, tpu.core_type = #tpu.core_type<tc>, window_params = [{transform_indices = @transform_0, window_bounds = array<i64: 64, 2048>}, {transform_indices = @transform_1, window_bounds = array<i64: 64, 256>}]} {
    %c0 = arith.constant 0 : index
    %c0_0 = arith.constant 0 : index
    %0 = vector.load %arg1[%c0, %c0_0] : memref<64x2048xf32, #tpu.memory_space<vmem>>, vector<64x256xf32>
    %c0_1 = arith.constant 0 : index
    %c256 = arith.constant 256 : index
    %1 = vector.load %arg1[%c0_1, %c256] : memref<64x2048xf32, #tpu.memory_space<vmem>>, vector<64x256xf32>
    %2 = arith.addf %0, %1 : vector<64x256xf32>
    %c0_2 = arith.constant 0 : index
    %c512 = arith.constant 512 : index
    %3 = vector.load %arg1[%c0_2, %c512] : memref<64x2048xf32, #tpu.memory_space<vmem>>, vector<64x256xf32>
    %4 = arith.addf %2, %3 : vector<64x256xf32>
    %c0_3 = arith.constant 0 : index
    %c768 = arith.constant 768 : index
    %5 = vector.load %arg1[%c0_3, %c768] : memref<64x2048xf32, #tpu.memory_space<vmem>>, vector<64x256xf32>
    %6 = arith.addf %4, %5 : vector<64x256xf32>
    %c0_4 = arith.constant 0 : index
    %c1024 = arith.constant 1024 : index
    %7 = vector.load %arg1[%c0_4, %c1024] : memref<64x2048xf32, #tpu.memory_space<vmem>>, vector<64x256xf32>
    %8 = arith.addf %6, %7 : vector<64x256xf32>
    %c0_5 = arith.constant 0 : index
    %c1280 = arith.constant 1280 : index
    %9 = vector.load %arg1[%c0_5, %c1280] : memref<64x2048xf32, #tpu.memory_space<vmem>>, vector<64x256xf32>
    %10 = arith.addf %8, %9 : vector<64x256xf32>
    %c0_6 = arith.constant 0 : index
    %c1536 = arith.constant 1536 : index
    %11 = vector.load %arg1[%c0_6, %c1536] : memref<64x2048xf32, #tpu.memory_space<vmem>>, vector<64x256xf32>
    %12 = arith.addf %10, %11 : vector<64x256xf32>
    %c0_7 = arith.constant 0 : index
    %c1792 = arith.constant 1792 : index
    %13 = vector.load %arg1[%c0_7, %c1792] : memref<64x2048xf32, #tpu.memory_space<vmem>>, vector<64x256xf32>
    %14 = arith.addf %12, %13 : vector<64x256xf32>
    %cst = arith.constant 1.250000e-01 : f32
    %15 = vector.broadcast %cst : f32 to vector<64x256xf32>
    %16 = arith.mulf %14, %15 : vector<64x256xf32>
    %c0_8 = arith.constant 0 : index
    %c0_9 = arith.constant 0 : index
    %17 = vector.load %arg2[%c0_8, %c0_9] : memref<64x256xf32, #tpu.memory_space<vmem>>, vector<64x256xf32>
    tpu.vector_store %arg2[%c0_8, %c0_9], %16 {strides = array<i32>} : memref<64x256xf32, #tpu.memory_space<vmem>>, vector<64x256xf32>,
    return
  }
  func.func @transform_0(%arg0: i32) -> (i32, i32) {
    %c0_i32 = arith.constant 0 : i32
    %c0_i32_0 = arith.constant 0 : i32
    return %arg0, %c0_i32 : i32, i32
  }
  func.func @transform_1(%arg0: i32) -> (i32, i32) {
    %c0_i32 = arith.constant 0 : i32
    %c0_i32_0 = arith.constant 0 : i32
    return %arg0, %c0_i32 : i32, i32
  }
}

</mosaic_0001>

<bundles_post_ra>
// kernel: tpu_custom_call.1
= control target key start
LH: loop header
LB: loop body
LE: loop exit
PB: predicated region body
PF: predicated region fallthrough
CT: control target
= control target key end

     0   :  { %6 = vsyncpa [#allocation3], 0  ;;  %s406_s0 = inlined_call_operand.hbm [shape: f32[64,2048], index: 0, kind: input, shape index: {}]   ;;  %s407_s1 = inlined_call_operand.hbm [shape: f32[64,256], index: 1, kind: output, shape index: {}]  }
   0x1   :  { %7 = vsyncpa [#allocation4], 0  ;;  %s366_s6 = smov [#allocation2]   ;;  %s318_s10 = scalar_lea.hbm %s406_s0, 16384 }
   0x2   :  { %s13_s7 = sshll.u32 %s366_s6, 4  ;;  %p319_p0 = scmp.ne.s32.totalorder %s406_s0, %s318_s10  ;;  %s14_s7 = int_to_ptr.vmem [resolvable:$true] %s13_s7 }
   0x3   :  { %p322_p1 = scmp.lt.u32.totalorder %s318_s10, %s406_s0 }
   0x5   :  { %p324_p2 = pnand %p322_p1, %p319_p0 }
   0x7   :  { %327 = shalt.err (!%p324_p2)
}
   0x8   :  { %s328_s15 = scalar_lea.vmem %s14_s7, 16384  ;;  %p333_p4 = scmp.lt.s32.totalorder %s14_s7, %s14_s7 }
   0x9   :  { %p329_p3 = scmp.ne.s32.totalorder %s14_s7, %s328_s15  ;;  %p334_p5 = scmp.lt.s32.totalorder %s328_s15, %s328_s15 }
   0xb   :  { %p335_p6 = por %p334_p5, %p333_p4 }
   0xd   :  { %p336_p7 = pnand %p335_p6, %p329_p3 }
   0xf   :  { %339 = shalt.err (!%p336_p7)
}
  0x10   :  { %s367_s16 = smov 2048   ;;  %s368_s17 = smov 128  }
  0x11   :  { %19 = dma.hbm_to_vmem [thread:$0]  %s406_s0, 16384, %s14_s7, [#allocation3], %s367_s16, %s367_s16, %s368_s17  }
  0x12   :  { %362 = dma.done.wait [#allocation3], 16384  }
  0x13   :  { %363 = vsyncadd [#allocation3], 4294950912  ;;  %v23_v0 = vld [vmem:[#allocation2] sm:$0xff]  ;;  %v39_v1 = vld [vmem:[#allocation2 + $0x10] sm:$0xff]  ;;  %s369_s0 = smov [#allocation5]  }
  0x14   :  { %v71_v2 = vld [vmem:[#allocation2 + $0x20] sm:$0xff]  ;;  %v55_v3 = vadd.f32 %v39_v1, %v23_v0  ;;  %v103_v4 = vld [vmem:[#allocation2 + $0x30] sm:$0xff]  ;;  %v24_v5 = vld [vmem:[#allocation2 + $0x8] sm:$0xff]  ;;  %s300_s20 = sshll.u32 %s369_s0, 4  ;;  %s301_s20 = int_to_ptr.vmem [resolvable:$true] %s300_s20 }
  0x15   :  { %v40_v7 = vld [vmem:[#allocation2 + $0x18] sm:$0xff]  ;;  %v72_v8 = vld [vmem:[#allocation2 + $0x28] sm:$0xff]  ;;  %v135_v9 = vld [vmem:[#allocation2 + $0x40] sm:$0xff]  ;;  %s340_s21 = scalar_lea.vmem %s301_s20, 2048  ;;  %p345_p9 = scmp.lt.s32.totalorder %s301_s20, %s301_s20 }
  0x16   :  { %v87_v6 = vadd.f32 %v71_v2, %v55_v3  ;;  %v56_v10 = vadd.f32 %v40_v7, %v24_v5  ;;  %v104_v12 = vld [vmem:[#allocation2 + $0x38] sm:$0xff]  ;;  %v25_v13 = vld [vmem:[#allocation2 + $0x80] sm:$0xff]  ;;  %v41_v14 = vld [vmem:[#allocation2 + $0x90] sm:$0xff]  ;;  %p341_p8 = scmp.ne.s32.totalorder %s301_s20, %s340_s21  ;;  %p346_p10 = scmp.lt.s32.totalorder %s340_s21, %s340_s21 }
  0x17   :  { %v167_v15 = vld [vmem:[#allocation2 + $0x50] sm:$0xff]  ;;  %v57_v17 = vadd.f32 %v41_v14, %v25_v13  ;;  %v73_v18 = vld [vmem:[#allocation2 + $0xa0] sm:$0xff]  ;;  %v136_v21 = vld [vmem:[#allocation2 + $0x48] sm:$0xff] }
  0x18   :  { %v119_v11 = vadd.f32 %v103_v4, %v87_v6  ;;  %v88_v16 = vadd.f32 %v72_v8, %v56_v10  ;;  %v199_v20 = vld [vmem:[#allocation2 + $0x60] sm:$0xff]  ;;  %v105_v22 = vld [vmem:[#allocation2 + $0xb0] sm:$0xff]  ;;  %v26_v25 = vld [vmem:[#allocation2 + $0x88] sm:$0xff]  ;;  %p347_p11 = por %p346_p10, %p345_p9 }
  0x19   :  { %v89_v24 = vadd.f32 %v73_v18, %v57_v17  ;;  %v42_v26 = vld [vmem:[#allocation2 + $0x98] sm:$0xff]  ;;  %v74_v27 = vld [vmem:[#allocation2 + $0xa8] sm:$0xff]  ;;  %v231_v29 = vld [vmem:[#allocation2 + $0x70] sm:$0xff] }
  0x1a   :  { %v151_v19 = vadd.f32 %v135_v9, %v119_v11  ;;  %v120_v23 = vadd.f32 %v104_v12, %v88_v16  ;;  %v168_v30 = vld [vmem:[#allocation2 + $0x58] sm:$0xff]  ;;  %v137_v31 = vld [vmem:[#allocation2 + $0xc0] sm:$0xff]  ;;  %v58_v32 = vadd.f32 %v42_v26, %v26_v25  ;;  %v200_v34 = vld [vmem:[#allocation2 + $0x68] sm:$0xff]  ;;  %p348_p12 = pnand %p347_p11, %p341_p8 }
  0x1b   :  { %v121_v35 = vadd.f32 %v105_v22, %v89_v24  ;;  %v106_v36 = vld [vmem:[#allocation2 + $0xb8] sm:$0xff]  ;;  %v27_v37 = vld [vmem:[#allocation2 + $0x100] sm:$0xff]  ;;  %v169_v39 = vld [vmem:[#allocation2 + $0xd0] sm:$0xff] }
  0x1c   :  { %v183_v28 = vadd.f32 %v167_v15, %v151_v19  ;;  %v152_v33 = vadd.f32 %v136_v21, %v120_v23  ;;  %v90_v40 = vadd.f32 %v74_v27, %v58_v32  ;;  %v43_v41 = vld [vmem:[#allocation2 + $0x110] sm:$0xff]  ;;  %v75_v42 = vld [vmem:[#allocation2 + $0x120] sm:$0xff]  ;;  %v232_v44 = vld [vmem:[#allocation2 + $0x78] sm:$0xff] }
  0x1d   :  { %v153_v45 = vadd.f32 %v137_v31, %v121_v35  ;;  %v201_v46 = vld [vmem:[#allocation2 + $0xe0] sm:$0xff]  ;;  %v138_v47 = vld [vmem:[#allocation2 + $0xc8] sm:$0xff]  ;;  %v59_v48 = vadd.f32 %v43_v41, %v27_v37  ;;  %v107_v51 = vld [vmem:[#allocation2 + $0x130] sm:$0xff] }
  0x1e   :  { %v215_v38 = vadd.f32 %v199_v20, %v183_v28  ;;  %v184_v43 = vadd.f32 %v168_v30, %v152_v33  ;;  %v122_v50 = vadd.f32 %v106_v36, %v90_v40  ;;  %v28_v52 = vld [vmem:[#allocation2 + $0x108] sm:$0xff]  ;;  %v44_v53 = vld [vmem:[#allocation2 + $0x118] sm:$0xff]  ;;  %v233_v56 = vld [vmem:[#allocation2 + $0xf0] sm:$0xff] }
  0x1f   :  { %v185_v55 = vadd.f32 %v169_v39, %v153_v45  ;;  %v170_v57 = vld [vmem:[#allocation2 + $0xd8] sm:$0xff]  ;;  %v91_v58 = vadd.f32 %v75_v42, %v59_v48  ;;  %v60_v59 = vadd.f32 %v44_v53, %v28_v52  ;;  %v76_v60 = vld [vmem:[#allocation2 + $0x128] sm:$0xff]  ;;  %v139_v0 = vld [vmem:[#allocation2 + $0x140] sm:$0xff] }
  0x20   :  { %v247_v49 = vadd.f32 %v231_v29, %v215_v38  ;;  %v216_v54 = vadd.f32 %v200_v34, %v184_v43  ;;  %v154_v62 = vadd.f32 %v138_v47, %v122_v50  ;;  %v202_v63 = vld [vmem:[#allocation2 + $0xe8] sm:$0xff]  ;;  %v108_v1 = vld [vmem:[#allocation2 + $0x138] sm:$0xff]  ;;  %v29_v6 = vld [vmem:[#allocation2 + $0x180] sm:$0xff] }
  0x21   :  { %v217_v3 = vadd.f32 %v201_v46, %v185_v55  ;;  %v123_v4 = vadd.f32 %v107_v51, %v91_v58  ;;  %v92_v5 = vadd.f32 %v76_v60, %v60_v59  ;;  %v45_v7 = vld [vmem:[#allocation2 + $0x190] sm:$0xff]  ;;  %v77_v8 = vld [vmem:[#allocation2 + $0x1a0] sm:$0xff]  ;;  %v234_v10 = vld [vmem:[#allocation2 + $0xf8] sm:$0xff] }
  0x22   :  { %v263_v61 = vmul.f32 0.125, %v247_v49  ;;  %v248_v2 = vadd.f32 %v232_v44, %v216_v54  ;;  %v186_v9 = vadd.f32 %v170_v57, %v154_v62  ;;  %v171_v11 = vld [vmem:[#allocation2 + $0x150] sm:$0xff]  ;;  %v140_v12 = vld [vmem:[#allocation2 + $0x148] sm:$0xff]  ;;  %v61_v13 = vadd.f32 %v45_v7, %v29_v6  ;;  %v203_v17 = vld [vmem:[#allocation2 + $0x160] sm:$0xff] }
  0x23   :  { %v249_v15 = vadd.f32 %v233_v56, %v217_v3  ;;  %v155_v16 = vadd.f32 %v139_v0, %v123_v4  ;;  %v124_v18 = vadd.f32 %v108_v1, %v92_v5  ;;  %v109_v19 = vld [vmem:[#allocation2 + $0x1b0] sm:$0xff]  ;;  %v30_v20 = vld [vmem:[#allocation2 + $0x188] sm:$0xff]  ;;  %v172_v22 = vld [vmem:[#allocation2 + $0x158] sm:$0xff] }
  0x24   :  { %279 = vst [vmem:[#allocation5] sm:$0xff] %v263_v61  ;;  %v264_v14 = vmul.f32 0.125, %v248_v2  ;;  %v218_v21 = vadd.f32 %v202_v63, %v186_v9  ;;  %v93_v23 = vadd.f32 %v77_v8, %v61_v13  ;;  %v46_v24 = vld [vmem:[#allocation2 + $0x198] sm:$0xff]  ;;  %v78_v25 = vld [vmem:[#allocation2 + $0x1a8] sm:$0xff]  ;;  %v235_v28 = vld [vmem:[#allocation2 + $0x170] sm:$0xff] }
  0x25   :  { %v265_v26 = vmul.f32 0.125, %v249_v15  ;;  %v187_v27 = vadd.f32 %v171_v11, %v155_v16  ;;  %v156_v29 = vadd.f32 %v140_v12, %v124_v18  ;;  %v204_v30 = vld [vmem:[#allocation2 + $0x168] sm:$0xff]  ;;  %v141_v31 = vld [vmem:[#allocation2 + $0x1c0] sm:$0xff]  ;;  %v62_v32 = vadd.f32 %v46_v24, %v30_v20  ;;  %v110_v35 = vld [vmem:[#allocation2 + $0x1b8] sm:$0xff] }
  0x26   :  { %280 = vst [vmem:[#allocation5 + $0x8] sm:$0xff] %v264_v14  ;;  %v250_v33 = vadd.f32 %v234_v10, %v218_v21  ;;  %v125_v34 = vadd.f32 %v109_v19, %v93_v23  ;;  %v31_v36 = vld [vmem:[#allocation2 + $0x200] sm:$0xff]  ;;  %v47_v37 = vld [vmem:[#allocation2 + $0x210] sm:$0xff]  ;;  %v236_v40 = vld [vmem:[#allocation2 + $0x178] sm:$0xff] }
  0x27   :  { %281 = vst [vmem:[#allocation5 + $0x10] sm:$0xff] %v265_v26  ;;  %v219_v38 = vadd.f32 %v203_v17, %v187_v27  ;;  %v188_v39 = vadd.f32 %v172_v22, %v156_v29  ;;  %v173_v41 = vld [vmem:[#allocation2 + $0x1d0] sm:$0xff]  ;;  %v94_v42 = vadd.f32 %v78_v25, %v62_v32  ;;  %v63_v43 = vadd.f32 %v47_v37, %v31_v36  ;;  %v79_v44 = vld [vmem:[#allocation2 + $0x220] sm:$0xff]  ;;  %v142_v48 = vld [vmem:[#allocation2 + $0x1c8] sm:$0xff] }
  0x28   :  { %v266_v45 = vmul.f32 0.125, %v250_v33  ;;  %v157_v46 = vadd.f32 %v141_v31, %v125_v34  ;;  %v205_v47 = vld [vmem:[#allocation2 + $0x1e0] sm:$0xff]  ;;  %v111_v49 = vld [vmem:[#allocation2 + $0x230] sm:$0xff]  ;;  %v32_v54 = vld [vmem:[#allocation2 + $0x208] sm:$0xff] }
  0x29   :  { %v251_v50 = vadd.f32 %v235_v28, %v219_v38  ;;  %v220_v51 = vadd.f32 %v204_v30, %v188_v39  ;;  %v126_v52 = vadd.f32 %v110_v35, %v94_v42  ;;  %v95_v53 = vadd.f32 %v79_v44, %v63_v43  ;;  %v48_v55 = vld [vmem:[#allocation2 + $0x218] sm:$0xff]  ;;  %v80_v56 = vld [vmem:[#allocation2 + $0x228] sm:$0xff]  ;;  %v237_v58 = vld [vmem:[#allocation2 + $0x1f0] sm:$0xff] }
  0x2a   :  { %282 = vst [vmem:[#allocation5 + $0x18] sm:$0xff] %v266_v45  ;;  %v189_v57 = vadd.f32 %v173_v41, %v157_v46  ;;  %v174_v59 = vld [vmem:[#allocation2 + $0x1d8] sm:$0xff]  ;;  %v143_v60 = vld [vmem:[#allocation2 + $0x240] sm:$0xff]  ;;  %v64_v61 = vadd.f32 %v48_v55, %v32_v54  ;;  %v206_v1 = vld [vmem:[#allocation2 + $0x1e8] sm:$0xff] }
  0x2b   :  { %v267_v62 = vmul.f32 0.125, %v251_v50  ;;  %v252_v63 = vadd.f32 %v236_v40, %v220_v51  ;;  %v158_v0 = vadd.f32 %v142_v48, %v126_v52  ;;  %v127_v2 = vadd.f32 %v111_v49, %v95_v53  ;;  %v112_v3 = vld [vmem:[#allocation2 + $0x238] sm:$0xff]  ;;  %v33_v4 = vld [vmem:[#allocation2 + $0x280] sm:$0xff]  ;;  %v175_v6 = vld [vmem:[#allocation2 + $0x250] sm:$0xff] }
  0x2c   :  { %v221_v5 = vadd.f32 %v205_v47, %v189_v57  ;;  %v96_v7 = vadd.f32 %v80_v56, %v64_v61  ;;  %v49_v8 = vld [vmem:[#allocation2 + $0x290] sm:$0xff]  ;;  %v81_v9 = vld [vmem:[#allocation2 + $0x2a0] sm:$0xff]  ;;  %v238_v12 = vld [vmem:[#allocation2 + $0x1f8] sm:$0xff] }
  0x2d   :  { %283 = vst [vmem:[#allocation5 + $0x20] sm:$0xff] %v267_v62  ;;  %v268_v10 = vmul.f32 0.125, %v252_v63  ;;  %v190_v11 = vadd.f32 %v174_v59, %v158_v0  ;;  %v159_v13 = vadd.f32 %v143_v60, %v127_v2  ;;  %v207_v14 = vld [vmem:[#allocation2 + $0x260] sm:$0xff]  ;;  %v144_v15 = vld [vmem:[#allocation2 + $0x248] sm:$0xff]  ;;  %v65_v16 = vadd.f32 %v49_v8, %v33_v4  ;;  %v113_v19 = vld [vmem:[#allocation2 + $0x2b0] sm:$0xff] }
  0x2e   :  { %v253_v17 = vadd.f32 %v237_v58, %v221_v5  ;;  %v128_v18 = vadd.f32 %v112_v3, %v96_v7  ;;  %v34_v20 = vld [vmem:[#allocation2 + $0x288] sm:$0xff]  ;;  %v50_v21 = vld [vmem:[#allocation2 + $0x298] sm:$0xff]  ;;  %v239_v24 = vld [vmem:[#allocation2 + $0x270] sm:$0xff] }
  0x2f   :  { %284 = vst [vmem:[#allocation5 + $0x28] sm:$0xff] %v268_v10  ;;  %v222_v22 = vadd.f32 %v206_v1, %v190_v11  ;;  %v191_v23 = vadd.f32 %v175_v6, %v159_v13  ;;  %v176_v25 = vld [vmem:[#allocation2 + $0x258] sm:$0xff]  ;;  %v97_v26 = vadd.f32 %v81_v9, %v65_v16  ;;  %v66_v27 = vadd.f32 %v50_v21, %v34_v20  ;;  %v82_v28 = vld [vmem:[#allocation2 + $0x2a8] sm:$0xff]  ;;  %v145_v32 = vld [vmem:[#allocation2 + $0x2c0] sm:$0xff] }
  0x30   :  { %v269_v29 = vmul.f32 0.125, %v253_v17  ;;  %v160_v30 = vadd.f32 %v144_v15, %v128_v18  ;;  %v208_v31 = vld [vmem:[#allocation2 + $0x268] sm:$0xff]  ;;  %v114_v33 = vld [vmem:[#allocation2 + $0x2b8] sm:$0xff]  ;;  %v35_v38 = vld [vmem:[#allocation2 + $0x300] sm:$0xff] }
  0x31   :  { %v254_v34 = vadd.f32 %v238_v12, %v222_v22  ;;  %v223_v35 = vadd.f32 %v207_v14, %v191_v23  ;;  %v129_v36 = vadd.f32 %v113_v19, %v97_v26  ;;  %v98_v37 = vadd.f32 %v82_v28, %v66_v27  ;;  %v51_v39 = vld [vmem:[#allocation2 + $0x310] sm:$0xff]  ;;  %v83_v40 = vld [vmem:[#allocation2 + $0x320] sm:$0xff]  ;;  %v240_v42 = vld [vmem:[#allocation2 + $0x278] sm:$0xff] }
  0x32   :  { %285 = vst [vmem:[#allocation5 + $0x30] sm:$0xff] %v269_v29  ;;  %v192_v41 = vadd.f32 %v176_v25, %v160_v30  ;;  %v177_v43 = vld [vmem:[#allocation2 + $0x2d0] sm:$0xff]  ;;  %v146_v44 = vld [vmem:[#allocation2 + $0x2c8] sm:$0xff]  ;;  %v67_v45 = vadd.f32 %v51_v39, %v35_v38  ;;  %v209_v49 = vld [vmem:[#allocation2 + $0x2e0] sm:$0xff] }
  0x33   :  { %v270_v46 = vmul.f32 0.125, %v254_v34  ;;  %v255_v47 = vadd.f32 %v239_v24, %v223_v35  ;;  %v161_v48 = vadd.f32 %v145_v32, %v129_v36  ;;  %v130_v50 = vadd.f32 %v114_v33, %v98_v37  ;;  %v115_v51 = vld [vmem:[#allocation2 + $0x330] sm:$0xff]  ;;  %v36_v52 = vld [vmem:[#allocation2 + $0x308] sm:$0xff]  ;;  %v178_v54 = vld [vmem:[#allocation2 + $0x2d8] sm:$0xff] }
  0x34   :  { %v224_v53 = vadd.f32 %v208_v31, %v192_v41  ;;  %v99_v55 = vadd.f32 %v83_v40, %v67_v45  ;;  %v52_v56 = vld [vmem:[#allocation2 + $0x318] sm:$0xff]  ;;  %v84_v57 = vld [vmem:[#allocation2 + $0x328] sm:$0xff]  ;;  %v241_v60 = vld [vmem:[#allocation2 + $0x2f0] sm:$0xff] }
  0x35   :  { %286 = vst [vmem:[#allocation5 + $0x38] sm:$0xff] %v270_v46  ;;  %v271_v58 = vmul.f32 0.125, %v255_v47  ;;  %v193_v59 = vadd.f32 %v177_v43, %v161_v48  ;;  %v162_v61 = vadd.f32 %v146_v44, %v130_v50  ;;  %v210_v62 = vld [vmem:[#allocation2 + $0x2e8] sm:$0xff]  ;;  %v147_v63 = vld [vmem:[#allocation2 + $0x340] sm:$0xff]  ;;  %v68_v0 = vadd.f32 %v52_v56, %v36_v52  ;;  %v116_v3 = vld [vmem:[#allocation2 + $0x338] sm:$0xff] }
  0x36   :  { %v256_v1 = vadd.f32 %v240_v42, %v224_v53  ;;  %v131_v2 = vadd.f32 %v115_v51, %v99_v55  ;;  %v37_v4 = vld [vmem:[#allocation2 + $0x380] sm:$0xff]  ;;  %v53_v5 = vld [vmem:[#allocation2 + $0x390] sm:$0xff]  ;;  %v242_v8 = vld [vmem:[#allocation2 + $0x2f8] sm:$0xff] }
  0x37   :  { %287 = vst [vmem:[#allocation5 + $0x40] sm:$0xff] %v271_v58  ;;  %v225_v6 = vadd.f32 %v209_v49, %v193_v59  ;;  %v194_v7 = vadd.f32 %v178_v54, %v162_v61  ;;  %v179_v9 = vld [vmem:[#allocation2 + $0x350] sm:$0xff]  ;;  %v100_v10 = vadd.f32 %v84_v57, %v68_v0  ;;  %v69_v11 = vadd.f32 %v53_v5, %v37_v4  ;;  %v85_v12 = vld [vmem:[#allocation2 + $0x3a0] sm:$0xff]  ;;  %v148_v16 = vld [vmem:[#allocation2 + $0x348] sm:$0xff] }
  0x38   :  { %v272_v13 = vmul.f32 0.125, %v256_v1  ;;  %v163_v14 = vadd.f32 %v147_v63, %v131_v2  ;;  %v211_v15 = vld [vmem:[#allocation2 + $0x360] sm:$0xff]  ;;  %v117_v17 = vld [vmem:[#allocation2 + $0x3b0] sm:$0xff]  ;;  %v38_v22 = vld [vmem:[#allocation2 + $0x388] sm:$0xff] }
  0x39   :  { %v257_v18 = vadd.f32 %v241_v60, %v225_v6  ;;  %v226_v19 = vadd.f32 %v210_v62, %v194_v7  ;;  %v132_v20 = vadd.f32 %v116_v3, %v100_v10  ;;  %v101_v21 = vadd.f32 %v85_v12, %v69_v11  ;;  %v54_v23 = vld [vmem:[#allocation2 + $0x398] sm:$0xff]  ;;  %v86_v24 = vld [vmem:[#allocation2 + $0x3a8] sm:$0xff]  ;;  %v149_v27 = vld [vmem:[#allocation2 + $0x3c0] sm:$0xff] }
  0x3a   :  { %288 = vst [vmem:[#allocation5 + $0x48] sm:$0xff] %v272_v13  ;;  %v195_v25 = vadd.f32 %v179_v9, %v163_v14  ;;  %v180_v26 = vld [vmem:[#allocation2 + $0x358] sm:$0xff]  ;;  %v70_v28 = vadd.f32 %v54_v23, %v38_v22  ;;  %v243_v31 = vld [vmem:[#allocation2 + $0x370] sm:$0xff]  ;;  %v212_v36 = vld [vmem:[#allocation2 + $0x368] sm:$0xff] }
  0x3b   :  { %v273_v29 = vmul.f32 0.125, %v257_v18  ;;  %v258_v30 = vadd.f32 %v242_v8, %v226_v19  ;;  %v164_v32 = vadd.f32 %v148_v16, %v132_v20  ;;  %v133_v33 = vadd.f32 %v117_v17, %v101_v21  ;;  %v118_v34 = vld [vmem:[#allocation2 + $0x3b8] sm:$0xff]  ;;  %v181_v37 = vld [vmem:[#allocation2 + $0x3d0] sm:$0xff]  ;;  %v150_v42 = vld [vmem:[#allocation2 + $0x3c8] sm:$0xff] }
  0x3c   :  { %v227_v35 = vadd.f32 %v211_v15, %v195_v25  ;;  %v102_v38 = vadd.f32 %v86_v24, %v70_v28  ;;  %v244_v44 = vld [vmem:[#allocation2 + $0x378] sm:$0xff]  ;;  %v213_v45 = vld [vmem:[#allocation2 + $0x3e0] sm:$0xff]  ;;  %v245_v51 = vld [vmem:[#allocation2 + $0x3f0] sm:$0xff] }
  0x3d   :  { %289 = vst [vmem:[#allocation5 + $0x50] sm:$0xff] %v273_v29  ;;  %v274_v39 = vmul.f32 0.125, %v258_v30  ;;  %v196_v40 = vadd.f32 %v180_v26, %v164_v32  ;;  %v165_v41 = vadd.f32 %v149_v27, %v133_v33  ;;  %v182_v49 = vld [vmem:[#allocation2 + $0x3d8] sm:$0xff]  ;;  %v214_v55 = vld [vmem:[#allocation2 + $0x3e8] sm:$0xff] }
  0x3e   :  { %v259_v43 = vadd.f32 %v243_v31, %v227_v35  ;;  %v134_v46 = vadd.f32 %v118_v34, %v102_v38  ;;  %v246_v59 = vld [vmem:[#allocation2 + $0x3f8] sm:$0xff] }
  0x3f   :  { %290 = vst [vmem:[#allocation5 + $0x58] sm:$0xff] %v274_v39  ;;  %v228_v47 = vadd.f32 %v212_v36, %v196_v40  ;;  %v197_v48 = vadd.f32 %v181_v37, %v165_v41 }
  0x40   :  { %v275_v50 = vmul.f32 0.125, %v259_v43  ;;  %v166_v52 = vadd.f32 %v150_v42, %v134_v46 }
  0x41   :  { %v260_v53 = vadd.f32 %v244_v44, %v228_v47  ;;  %v229_v54 = vadd.f32 %v213_v45, %v197_v48 }
  0x42   :  { %291 = vst [vmem:[#allocation5 + $0x60] sm:$0xff] %v275_v50  ;;  %v198_v56 = vadd.f32 %v182_v49, %v166_v52 }
  0x43   :  { %v276_v57 = vmul.f32 0.125, %v260_v53  ;;  %v261_v58 = vadd.f32 %v245_v51, %v229_v54 }
  0x44   :  { %v230_v60 = vadd.f32 %v214_v55, %v198_v56 }
  0x45   :  { %292 = vst [vmem:[#allocation5 + $0x68] sm:$0xff] %v276_v57  ;;  %v277_v61 = vmul.f32 0.125, %v261_v58 }
  0x46   :  { %v262_v62 = vadd.f32 %v246_v59, %v230_v60 }
  0x47   :  { %293 = vst [vmem:[#allocation5 + $0x70] sm:$0xff] %v277_v61 }
  0x48   :  { %v278_v63 = vmul.f32 0.125, %v262_v62 }
  0x4a   :  { %294 = vst [vmem:[#allocation5 + $0x78] sm:$0xff] %v278_v63 }
  0x4b   :  { %351 = shalt.err (!%p348_p12)
}
  0x4c   :  { %s352_s24 = scalar_lea.hbm %s407_s1, 2048 }
  0x4d   :  { %p353_p13 = scmp.ne.s32.totalorder %s407_s1, %s352_s24  ;;  %p356_p0 = scmp.lt.u32.totalorder %s352_s24, %s407_s1 }
  0x4f   :  { %p358_p1 = pnand %p356_p0, %p353_p13 }
  0x51   :  { %361 = shalt.err (!%p358_p1)
}
  0x52   :  { %s370_s29 = smov 256   ;;  %s371_s30 = smov 16  }
  0x53   :  { %306 = dma.vmem_to_hbm [thread:$0]  %s301_s20, 2048, %s407_s1, [#allocation4], %s370_s29, %s370_s29, %s371_s30  }
  0x54   :  { %364 = dma.done.wait [#allocation4], 2048  }
  0x55   :  { %365 = vsyncadd [#allocation4], 4294965248 }
  0x56   :  { %310 = vsyncpa [#allocation3], 1 }
  0x57   :  { %311 = vsyncpa [#allocation4], 1 }

</bundles_post_ra>
